<compile_context>
chip_gen: v7x
topology: tpu7x:2x2x1
jax: 0.10.0
libtpu: 0.0.40
codegen_flags: <defaults>
</compile_context>

<pallas_src>
import functools

import jax
import jax.numpy as jnp
from jax import lax
from jax.experimental import pallas as pl
from jax.experimental.pallas import tpu as pltpu


def _vicreg_kernel(z1_ref, z2_ref, out_ref,
                   g1_ref, g2_ref, s1_ref, s2_ref, sim_ref,
                   *, lambd, mu, nu, gamma, n, d):
    i = pl.program_id(0)
    nsteps = pl.num_programs(0)

    # ---- init accumulators on the first grid step --------------------------
    @pl.when(i == 0)
    def _init():
        g1_ref[...] = jnp.zeros_like(g1_ref)
        g2_ref[...] = jnp.zeros_like(g2_ref)
        s1_ref[...] = jnp.zeros_like(s1_ref)
        s2_ref[...] = jnp.zeros_like(s2_ref)
        sim_ref[...] = jnp.zeros_like(sim_ref)

    z1 = z1_ref[...]
    z2 = z2_ref[...]

    # ---- Gram accumulation on the MXU (contract dim 0, no transpose) -------
    dn = (((0,), (0,)), ((), ()))
    g1_ref[...] += lax.dot_general(z1, z1, dn, preferred_element_type=jnp.float32)
    g2_ref[...] += lax.dot_general(z2, z2, dn, preferred_element_type=jnp.float32)

    # ---- VPU accumulators (single f32 cast per tile) ------------------------
    z1f = z1.astype(jnp.float32)
    z2f = z2.astype(jnp.float32)
    diff = z1f - z2f
    sim_ref[...] += jnp.sum(diff * diff, axis=0, keepdims=True)   # (1, D)
    s1_ref[...] += jnp.sum(z1f, axis=0, keepdims=True)            # (1, D)
    s2_ref[...] += jnp.sum(z2f, axis=0, keepdims=True)            # (1, D)

    # ---- finalize on the last grid step -------------------------------------
    @pl.when(i == nsteps - 1)
    def _finalize():
        inv_n = 1.0 / n
        inv_nm1 = 1.0 / (n - 1)

        rows = lax.broadcasted_iota(jnp.int32, (d, d), 0)
        cols = lax.broadcasted_iota(jnp.int32, (d, d), 1)
        eye = rows == cols

        def centered_stats(g_ref, s_ref):
            s = s_ref[...]                                        # (1, D)
            # Centered Gram: C = G - (S^T S) / n  (outer product via MXU).
            c = g_ref[...] - lax.dot_general(
                s, s, dn, preferred_element_type=jnp.float32) * inv_n
            diag_c = jnp.where(eye, c, 0.0)
            var = jnp.sum(diag_c, axis=0, keepdims=True) * inv_nm1        # (1, D)
            # Off-diagonal squared covariance sum; 1/(n-1)^2 applied as a
            # scalar rescale (no DxD divide/mul by the factor).
            off_sq = (jnp.sum(c * c) - jnp.sum(diag_c * diag_c)) * (inv_nm1 * inv_nm1)
            return var, off_sq

        var1, off1 = centered_stats(g1_ref, s1_ref)
        var2, off2 = centered_stats(g2_ref, s2_ref)

        std1 = jnp.sqrt(var1 + 0.0001)
        std2 = jnp.sqrt(var2 + 0.0001)
        v_z1 = jnp.sum(jnp.maximum(gamma - std1, 0.0)) / d
        v_z2 = jnp.sum(jnp.maximum(gamma - std2, 0.0)) / d
        var_loss = v_z1 + v_z2

        sim_loss = jnp.sum(sim_ref[...]) / (n * d)
        cov_loss = (off1 + off2) / d

        out_ref[0, 0] = lambd * sim_loss + mu * var_loss + nu * cov_loss


def _pick_tile_n(n, d, itemsize):
    """N-tile: ~4 MiB per input tile (hides DMA), multiple of 8 sublanes."""
    target_rows = (4 << 20) // max(1, d * itemsize)
    tile = max(8, min(1024, (target_rows // 8) * 8))
    n_pad8 = ((n + 7) // 8) * 8
    return min(tile, n_pad8)


def vicreg_loss_pallas(z1, z2, lambd, mu, nu=1.0, gamma=1.0):
    assert z1.shape == z2.shape and z1.ndim == 2
    n, d = z1.shape
    itemsize = jnp.dtype(z1.dtype).itemsize

    tile_n = _pick_tile_n(n, d, itemsize)
    n_pad = -(-n // tile_n) * tile_n
    if n_pad != n:
        # Zero rows contribute nothing to the sums / Gram / sim accumulators,
        # so zero-padding the batch axis is exact (true n used in the algebra).
        z1 = jnp.pad(z1, ((0, n_pad - n), (0, 0)))
        z2 = jnp.pad(z2, ((0, n_pad - n), (0, 0)))

    grid = (n_pad // tile_n,)

    kernel = functools.partial(
        _vicreg_kernel,
        lambd=float(lambd), mu=float(mu), nu=float(nu), gamma=float(gamma),
        n=int(n), d=int(d),
    )

    # VMEM budget: 2 DxD Gram accumulators + ~4 DxD finalize temporaries +
    # double-buffered input tiles + small (1,D) vectors, with headroom.
    vmem_est = (6 * d * d * 4
                + 2 * 2 * tile_n * d * itemsize
                + 16 * d * 4
                + (4 << 20))
    vmem_limit = int(min(max(vmem_est, 16 << 20), 100 << 20))

    cost = pl.CostEstimate(
        flops=int(4 * n_pad * d * d + 6 * d * d),
        transcendentals=int(2 * d),
        bytes_accessed=int(2 * n_pad * d * itemsize + 4),
    )

    out = pl.pallas_call(
        kernel,
        out_shape=jax.ShapeDtypeStruct((1, 1), jnp.float32),
        grid_spec=pltpu.PrefetchScalarGridSpec(
            num_scalar_prefetch=0,
            grid=grid,
            in_specs=[
                pl.BlockSpec((tile_n, d), lambda i: (i, 0)),
                pl.BlockSpec((tile_n, d), lambda i: (i, 0)),
            ],
            out_specs=pl.BlockSpec((1, 1), lambda i: (0, 0),
                                   memory_space=pltpu.SMEM),
            scratch_shapes=[
                pltpu.VMEM((d, d), jnp.float32),   # G1 = z1^T z1 accumulator
                pltpu.VMEM((d, d), jnp.float32),   # G2 = z2^T z2 accumulator
                pltpu.VMEM((1, d), jnp.float32),   # sum(z1, axis=0)
                pltpu.VMEM((1, d), jnp.float32),   # sum(z2, axis=0)
                pltpu.VMEM((1, d), jnp.float32),   # per-feature sum((z1-z2)^2)
            ],
        ),
        compiler_params=pltpu.CompilerParams(
            dimension_semantics=("arbitrary",),
            vmem_limit_bytes=vmem_limit,
        ),
        cost_estimate=cost,
    )(z1, z2)
    return out[0, 0]


def vicreg_loss_ref(z1, z2, lambd, mu, nu=1.0, gamma=1.0):
    """Plain-JAX reference mirroring the PyTorch semantics."""
    z1 = z1.astype(jnp.float32)
    z2 = z2.astype(jnp.float32)
    n, d = z1.shape
    std_z1 = jnp.sqrt(jnp.var(z1, axis=0, ddof=1) + 0.0001)
    std_z2 = jnp.sqrt(jnp.var(z2, axis=0, ddof=1) + 0.0001)
    v_z1 = jnp.mean(jax.nn.relu(gamma - std_z1))
    v_z2 = jnp.mean(jax.nn.relu(gamma - std_z2))
    var_loss = v_z1 + v_z2
    sim_loss = jnp.mean((z1 - z2) ** 2)
    z1c = z1 - z1.mean(axis=0)
    z2c = z2 - z2.mean(axis=0)
    cov1 = z1c.T @ z1c / (n - 1)
    cov2 = z2c.T @ z2c / (n - 1)
    off1 = jnp.sum(cov1**2) - jnp.sum(jnp.diag(cov1) ** 2)
    off2 = jnp.sum(cov2**2) - jnp.sum(jnp.diag(cov2) ** 2)
    cov_loss = off1 / d + off2 / d
    return lambd * sim_loss + mu * var_loss + nu * cov_loss


class VICRegLoss:
    """VICReg loss module (Pallas TPU implementation)."""

    def __init__(self, lambd, mu, nu=1.0, gamma=1.0):
        self.lambd = lambd
        self.mu = mu
        self.nu = nu
        self.gamma = gamma

    def __call__(self, z1, z2):
        return vicreg_loss_pallas(z1, z2, self.lambd, self.mu, self.nu, self.gamma)


if __name__ == "__main__":
    key = jax.random.PRNGKey(0)
    k1, k2 = jax.random.split(key)
    N, D = 8, 32  # batch=8 samples, hidden=32 features
    z1 = jax.random.normal(k1, (N, D), dtype=jnp.float32)
    z2 = z1 + 0.1 * jax.random.normal(k2, (N, D), dtype=jnp.float32)

    loss_mod = VICRegLoss(lambd=25.0, mu=25.0, nu=1.0, gamma=1.0)
    loss = loss_mod(z1, z2)
    jax.block_until_ready(loss)

    ref = vicreg_loss_ref(z1, z2, 25.0, 25.0, 1.0, 1.0)
    assert jnp.allclose(loss, ref, rtol=1e-4, atol=1e-4), (loss, ref)
    print("KERNEL_OK")
</pallas_src>

<mosaic_0001>
module attributes {stable_mosaic.version = 11 : i64} {
  func.func @_vicreg_kernel(%arg0: i32, %arg1: memref<8x32xf32, #tpu.memory_space<vmem>>, %arg2: memref<8x32xf32, #tpu.memory_space<vmem>>, %arg3: memref<1x1xf32, #tpu.memory_space<smem>>, %arg4: memref<32x32xf32, #tpu.memory_space<vmem>>, %arg5: memref<32x32xf32, #tpu.memory_space<vmem>>, %arg6: memref<1x32xf32, #tpu.memory_space<vmem>>, %arg7: memref<1x32xf32, #tpu.memory_space<vmem>>, %arg8: memref<1x32xf32, #tpu.memory_space<vmem>>) attributes {dimension_semantics = [#tpu.dimension_semantics<arbitrary>], iteration_bounds = array<i64: 1>, scalar_prefetch = 0 : i64, scratch_operands = 5 : i64, tpu.core_type = #tpu.core_type<tc>, window_params = [{transform_indices = @transform_0, window_bounds = array<i64: 8, 32>}, {transform_indices = @transform_1, window_bounds = array<i64: 8, 32>}, {transform_indices = @transform_2, window_bounds = array<i64: 1, 1>}]} {
    %c0_i32 = arith.constant 0 : i32
    %0 = arith.cmpi eq, %arg0, %c0_i32 : i32
    %1 = arith.extui %0 : i1 to i32
    %c0_i32_0 = arith.constant 0 : i32
    %2 = arith.cmpi ne, %1, %c0_i32_0 : i32
    scf.if %2 {
      %cst_30 = arith.constant 0.000000e+00 : f32
      %33 = vector.broadcast %cst_30 : f32 to vector<32x32xf32>
      %c0_31 = arith.constant 0 : index
      %c0_32 = arith.constant 0 : index
      %34 = vector.load %arg4[%c0_31, %c0_32] : memref<32x32xf32, #tpu.memory_space<vmem>>, vector<32x32xf32>
      tpu.vector_store %arg4[%c0_31, %c0_32], %33 {strides = array<i32>} : memref<32x32xf32, #tpu.memory_space<vmem>>, vector<32x32xf32>,
      %cst_33 = arith.constant 0.000000e+00 : f32
      %35 = vector.broadcast %cst_33 : f32 to vector<32x32xf32>
      %c0_34 = arith.constant 0 : index
      %c0_35 = arith.constant 0 : index
      %36 = vector.load %arg5[%c0_34, %c0_35] : memref<32x32xf32, #tpu.memory_space<vmem>>, vector<32x32xf32>
      tpu.vector_store %arg5[%c0_34, %c0_35], %35 {strides = array<i32>} : memref<32x32xf32, #tpu.memory_space<vmem>>, vector<32x32xf32>,
      %cst_36 = arith.constant 0.000000e+00 : f32
      %37 = vector.broadcast %cst_36 : f32 to vector<1x32xf32>
      %c0_37 = arith.constant 0 : index
      %c0_38 = arith.constant 0 : index
      %38 = vector.load %arg6[%c0_37, %c0_38] : memref<1x32xf32, #tpu.memory_space<vmem>>, vector<1x32xf32>
      tpu.vector_store %arg6[%c0_37, %c0_38], %37 {strides = array<i32>} : memref<1x32xf32, #tpu.memory_space<vmem>>, vector<1x32xf32>,
      %cst_39 = arith.constant 0.000000e+00 : f32
      %39 = vector.broadcast %cst_39 : f32 to vector<1x32xf32>
      %c0_40 = arith.constant 0 : index
      %c0_41 = arith.constant 0 : index
      %40 = vector.load %arg7[%c0_40, %c0_41] : memref<1x32xf32, #tpu.memory_space<vmem>>, vector<1x32xf32>
      tpu.vector_store %arg7[%c0_40, %c0_41], %39 {strides = array<i32>} : memref<1x32xf32, #tpu.memory_space<vmem>>, vector<1x32xf32>,
      %cst_42 = arith.constant 0.000000e+00 : f32
      %41 = vector.broadcast %cst_42 : f32 to vector<1x32xf32>
      %c0_43 = arith.constant 0 : index
      %c0_44 = arith.constant 0 : index
      %42 = vector.load %arg8[%c0_43, %c0_44] : memref<1x32xf32, #tpu.memory_space<vmem>>, vector<1x32xf32>
      tpu.vector_store %arg8[%c0_43, %c0_44], %41 {strides = array<i32>} : memref<1x32xf32, #tpu.memory_space<vmem>>, vector<1x32xf32>,
    } else {
    }
    %c0 = arith.constant 0 : index
    %c0_1 = arith.constant 0 : index
    %3 = vector.load %arg1[%c0, %c0_1] : memref<8x32xf32, #tpu.memory_space<vmem>>, vector<8x32xf32>
    %c0_2 = arith.constant 0 : index
    %c0_3 = arith.constant 0 : index
    %4 = vector.load %arg2[%c0_2, %c0_3] : memref<8x32xf32, #tpu.memory_space<vmem>>, vector<8x32xf32>
    %c0_4 = arith.constant 0 : index
    %c0_5 = arith.constant 0 : index
    %5 = vector.load %arg4[%c0_4, %c0_5] : memref<32x32xf32, #tpu.memory_space<vmem>>, vector<32x32xf32>
    %cst = arith.constant dense<0.000000e+00> : vector<32x32xf32>
    %6 = tpu.matmul %3, %3, %cst {dimension_numbers = #tpu.dot_dimension_numbers<[0], [0], [1], [1], [0, 1, 1, 1], [], []>} : vector<8x32xf32>, vector<8x32xf32>, vector<32x32xf32> -> vector<32x32xf32>
    %7 = arith.addf %5, %6 : vector<32x32xf32>
    %c0_6 = arith.constant 0 : index
    %c0_7 = arith.constant 0 : index
    %8 = vector.load %arg4[%c0_6, %c0_7] : memref<32x32xf32, #tpu.memory_space<vmem>>, vector<32x32xf32>
    tpu.vector_store %arg4[%c0_6, %c0_7], %7 {strides = array<i32>} : memref<32x32xf32, #tpu.memory_space<vmem>>, vector<32x32xf32>,
    %c0_8 = arith.constant 0 : index
    %c0_9 = arith.constant 0 : index
    %9 = vector.load %arg5[%c0_8, %c0_9] : memref<32x32xf32, #tpu.memory_space<vmem>>, vector<32x32xf32>
    %cst_10 = arith.constant dense<0.000000e+00> : vector<32x32xf32>
    %10 = tpu.matmul %4, %4, %cst_10 {dimension_numbers = #tpu.dot_dimension_numbers<[0], [0], [1], [1], [0, 1, 1, 1], [], []>} : vector<8x32xf32>, vector<8x32xf32>, vector<32x32xf32> -> vector<32x32xf32>
    %11 = arith.addf %9, %10 : vector<32x32xf32>
    %c0_11 = arith.constant 0 : index
    %c0_12 = arith.constant 0 : index
    %12 = vector.load %arg5[%c0_11, %c0_12] : memref<32x32xf32, #tpu.memory_space<vmem>>, vector<32x32xf32>
    tpu.vector_store %arg5[%c0_11, %c0_12], %11 {strides = array<i32>} : memref<32x32xf32, #tpu.memory_space<vmem>>, vector<32x32xf32>,
    %13 = arith.subf %3, %4 : vector<8x32xf32>
    %c0_13 = arith.constant 0 : index
    %c0_14 = arith.constant 0 : index
    %14 = vector.load %arg8[%c0_13, %c0_14] : memref<1x32xf32, #tpu.memory_space<vmem>>, vector<1x32xf32>
    %15 = arith.mulf %13, %13 : vector<8x32xf32>
    %cst_15 = arith.constant dense<0.000000e+00> : vector<32xf32>
    %16 = vector.multi_reduction <add>, %15, %cst_15 [0] : vector<8x32xf32> to vector<32xf32>
    %17 = vector.shape_cast %16 : vector<32xf32> to vector<1x32xf32>
    %18 = arith.addf %14, %17 : vector<1x32xf32>
    %c0_16 = arith.constant 0 : index
    %c0_17 = arith.constant 0 : index
    %19 = vector.load %arg8[%c0_16, %c0_17] : memref<1x32xf32, #tpu.memory_space<vmem>>, vector<1x32xf32>
    tpu.vector_store %arg8[%c0_16, %c0_17], %18 {strides = array<i32>} : memref<1x32xf32, #tpu.memory_space<vmem>>, vector<1x32xf32>,
    %c0_18 = arith.constant 0 : index
    %c0_19 = arith.constant 0 : index
    %20 = vector.load %arg6[%c0_18, %c0_19] : memref<1x32xf32, #tpu.memory_space<vmem>>, vector<1x32xf32>
    %cst_20 = arith.constant dense<0.000000e+00> : vector<32xf32>
    %21 = vector.multi_reduction <add>, %3, %cst_20 [0] : vector<8x32xf32> to vector<32xf32>
    %22 = vector.shape_cast %21 : vector<32xf32> to vector<1x32xf32>
    %23 = arith.addf %20, %22 : vector<1x32xf32>
    %c0_21 = arith.constant 0 : index
    %c0_22 = arith.constant 0 : index
    %24 = vector.load %arg6[%c0_21, %c0_22] : memref<1x32xf32, #tpu.memory_space<vmem>>, vector<1x32xf32>
    tpu.vector_store %arg6[%c0_21, %c0_22], %23 {strides = array<i32>} : memref<1x32xf32, #tpu.memory_space<vmem>>, vector<1x32xf32>,
    %c0_23 = arith.constant 0 : index
    %c0_24 = arith.constant 0 : index
    %25 = vector.load %arg7[%c0_23, %c0_24] : memref<1x32xf32, #tpu.memory_space<vmem>>, vector<1x32xf32>
    %cst_25 = arith.constant dense<0.000000e+00> : vector<32xf32>
    %26 = vector.multi_reduction <add>, %4, %cst_25 [0] : vector<8x32xf32> to vector<32xf32>
    %27 = vector.shape_cast %26 : vector<32xf32> to vector<1x32xf32>
    %28 = arith.addf %25, %27 : vector<1x32xf32>
    %c0_26 = arith.constant 0 : index
    %c0_27 = arith.constant 0 : index
    %29 = vector.load %arg7[%c0_26, %c0_27] : memref<1x32xf32, #tpu.memory_space<vmem>>, vector<1x32xf32>
    tpu.vector_store %arg7[%c0_26, %c0_27], %28 {strides = array<i32>} : memref<1x32xf32, #tpu.memory_space<vmem>>, vector<1x32xf32>,
    %c0_i32_28 = arith.constant 0 : i32
    %30 = arith.cmpi eq, %arg0, %c0_i32_28 : i32
    %31 = arith.extui %30 : i1 to i32
    %c0_i32_29 = arith.constant 0 : i32
    %32 = arith.cmpi ne, %31, %c0_i32_29 : i32
    scf.if %32 {
      %33 = tpu.iota {dimensions = array<i32: 0>} : vector<32x32xi32>
      %34 = tpu.iota {dimensions = array<i32: 1>} : vector<32x32xi32>
      %35 = arith.cmpi eq, %33, %34 : vector<32x32xi32>
      %c0_30 = arith.constant 0 : index
      %c0_31 = arith.constant 0 : index
      %36 = vector.load %arg6[%c0_30, %c0_31] : memref<1x32xf32, #tpu.memory_space<vmem>>, vector<1x32xf32>
      %c0_32 = arith.constant 0 : index
      %c0_33 = arith.constant 0 : index
      %37 = vector.load %arg4[%c0_32, %c0_33] : memref<32x32xf32, #tpu.memory_space<vmem>>, vector<32x32xf32>
      %cst_34 = arith.constant dense<0.000000e+00> : vector<32x32xf32>
      %38 = tpu.matmul %36, %36, %cst_34 {dimension_numbers = #tpu.dot_dimension_numbers<[0], [0], [1], [1], [0, 1, 1, 1], [], []>} : vector<1x32xf32>, vector<1x32xf32>, vector<32x32xf32> -> vector<32x32xf32>
      %cst_35 = arith.constant 1.250000e-01 : f32
      %39 = vector.broadcast %cst_35 : f32 to vector<32x32xf32>
      %40 = arith.mulf %38, %39 : vector<32x32xf32>
      %41 = arith.subf %37, %40 : vector<32x32xf32>
      %cst_36 = arith.constant 0.000000e+00 : f32
      %42 = vector.broadcast %cst_36 : f32 to vector<32x32xf32>
      %43 = arith.select %35, %41, %42 : vector<32x32xi1>, vector<32x32xf32>
      %cst_37 = arith.constant dense<0.000000e+00> : vector<32xf32>
      %44 = vector.multi_reduction <add>, %43, %cst_37 [0] : vector<32x32xf32> to vector<32xf32>
      %45 = vector.shape_cast %44 : vector<32xf32> to vector<1x32xf32>
      %cst_38 = arith.constant 0.142857149 : f32
      %46 = vector.broadcast %cst_38 : f32 to vector<1x32xf32>
      %47 = arith.mulf %45, %46 : vector<1x32xf32>
      %48 = arith.mulf %41, %41 : vector<32x32xf32>
      %49 = vector.shape_cast %48 : vector<32x32xf32> to vector<1x32x32xf32>
      %cst_39 = arith.constant dense<0.000000e+00> : vector<1xf32>
      %50 = vector.multi_reduction <add>, %49, %cst_39 [1, 2] : vector<1x32x32xf32> to vector<1xf32>
      %51 = vector.shape_cast %50 : vector<1xf32> to vector<1x1x1xf32>
      %52 = vector.extract %51[0, 0, 0] : f32 from vector<1x1x1xf32>
      %53 = arith.mulf %43, %43 : vector<32x32xf32>
      %54 = vector.shape_cast %53 : vector<32x32xf32> to vector<1x32x32xf32>
      %cst_40 = arith.constant dense<0.000000e+00> : vector<1xf32>
      %55 = vector.multi_reduction <add>, %54, %cst_40 [1, 2] : vector<1x32x32xf32> to vector<1xf32>
      %56 = vector.shape_cast %55 : vector<1xf32> to vector<1x1x1xf32>
      %57 = vector.extract %56[0, 0, 0] : f32 from vector<1x1x1xf32>
      %58 = arith.subf %52, %57 : f32
      %cst_41 = arith.constant 0.0204081628 : f32
      %59 = arith.mulf %58, %cst_41 : f32
      %c0_42 = arith.constant 0 : index
      %c0_43 = arith.constant 0 : index
      %60 = vector.load %arg7[%c0_42, %c0_43] : memref<1x32xf32, #tpu.memory_space<vmem>>, vector<1x32xf32>
      %c0_44 = arith.constant 0 : index
      %c0_45 = arith.constant 0 : index
      %61 = vector.load %arg5[%c0_44, %c0_45] : memref<32x32xf32, #tpu.memory_space<vmem>>, vector<32x32xf32>
      %cst_46 = arith.constant dense<0.000000e+00> : vector<32x32xf32>
      %62 = tpu.matmul %60, %60, %cst_46 {dimension_numbers = #tpu.dot_dimension_numbers<[0], [0], [1], [1], [0, 1, 1, 1], [], []>} : vector<1x32xf32>, vector<1x32xf32>, vector<32x32xf32> -> vector<32x32xf32>
      %cst_47 = arith.constant 1.250000e-01 : f32
      %63 = vector.broadcast %cst_47 : f32 to vector<32x32xf32>
      %64 = arith.mulf %62, %63 : vector<32x32xf32>
      %65 = arith.subf %61, %64 : vector<32x32xf32>
      %cst_48 = arith.constant 0.000000e+00 : f32
      %66 = vector.broadcast %cst_48 : f32 to vector<32x32xf32>
      %67 = arith.select %35, %65, %66 : vector<32x32xi1>, vector<32x32xf32>
      %cst_49 = arith.constant dense<0.000000e+00> : vector<32xf32>
      %68 = vector.multi_reduction <add>, %67, %cst_49 [0] : vector<32x32xf32> to vector<32xf32>
      %69 = vector.shape_cast %68 : vector<32xf32> to vector<1x32xf32>
      %cst_50 = arith.constant 0.142857149 : f32
      %70 = vector.broadcast %cst_50 : f32 to vector<1x32xf32>
      %71 = arith.mulf %69, %70 : vector<1x32xf32>
      %72 = arith.mulf %65, %65 : vector<32x32xf32>
      %73 = vector.shape_cast %72 : vector<32x32xf32> to vector<1x32x32xf32>
      %cst_51 = arith.constant dense<0.000000e+00> : vector<1xf32>
      %74 = vector.multi_reduction <add>, %73, %cst_51 [1, 2] : vector<1x32x32xf32> to vector<1xf32>
      %75 = vector.shape_cast %74 : vector<1xf32> to vector<1x1x1xf32>
      %76 = vector.extract %75[0, 0, 0] : f32 from vector<1x1x1xf32>
      %77 = arith.mulf %67, %67 : vector<32x32xf32>
      %78 = vector.shape_cast %77 : vector<32x32xf32> to vector<1x32x32xf32>
      %cst_52 = arith.constant dense<0.000000e+00> : vector<1xf32>
      %79 = vector.multi_reduction <add>, %78, %cst_52 [1, 2] : vector<1x32x32xf32> to vector<1xf32>
      %80 = vector.shape_cast %79 : vector<1xf32> to vector<1x1x1xf32>
      %81 = vector.extract %80[0, 0, 0] : f32 from vector<1x1x1xf32>
      %82 = arith.subf %76, %81 : f32
      %cst_53 = arith.constant 0.0204081628 : f32
      %83 = arith.mulf %82, %cst_53 : f32
      %cst_54 = arith.constant 9.99999974E-5 : f32
      %84 = vector.broadcast %cst_54 : f32 to vector<1x32xf32>
      %85 = arith.addf %47, %84 : vector<1x32xf32>
      %86 = math.sqrt %85 : vector<1x32xf32>
      %cst_55 = arith.constant 9.99999974E-5 : f32
      %87 = vector.broadcast %cst_55 : f32 to vector<1x32xf32>
      %88 = arith.addf %71, %87 : vector<1x32xf32>
      %89 = math.sqrt %88 : vector<1x32xf32>
      %cst_56 = arith.constant 1.000000e+00 : f32
      %90 = vector.broadcast %cst_56 : f32 to vector<1x32xf32>
      %91 = arith.subf %90, %86 : vector<1x32xf32>
      %cst_57 = arith.constant 0.000000e+00 : f32
      %92 = vector.broadcast %cst_57 : f32 to vector<1x32xf32>
      %93 = arith.maximumf %91, %92 : vector<1x32xf32>
      %94 = vector.shape_cast %93 : vector<1x32xf32> to vector<1x1x32xf32>
      %cst_58 = arith.constant dense<0.000000e+00> : vector<1xf32>
      %95 = vector.multi_reduction <add>, %94, %cst_58 [1, 2] : vector<1x1x32xf32> to vector<1xf32>
      %96 = vector.shape_cast %95 : vector<1xf32> to vector<1x1x1xf32>
      %97 = vector.extract %96[0, 0, 0] : f32 from vector<1x1x1xf32>
      %cst_59 = arith.constant 3.200000e+01 : f32
      %98 = arith.divf %97, %cst_59 : f32
      %cst_60 = arith.constant 1.000000e+00 : f32
      %99 = vector.broadcast %cst_60 : f32 to vector<1x32xf32>
      %100 = arith.subf %99, %89 : vector<1x32xf32>
      %cst_61 = arith.constant 0.000000e+00 : f32
      %101 = vector.broadcast %cst_61 : f32 to vector<1x32xf32>
      %102 = arith.maximumf %100, %101 : vector<1x32xf32>
      %103 = vector.shape_cast %102 : vector<1x32xf32> to vector<1x1x32xf32>
      %cst_62 = arith.constant dense<0.000000e+00> : vector<1xf32>
      %104 = vector.multi_reduction <add>, %103, %cst_62 [1, 2] : vector<1x1x32xf32> to vector<1xf32>
      %105 = vector.shape_cast %104 : vector<1xf32> to vector<1x1x1xf32>
      %106 = vector.extract %105[0, 0, 0] : f32 from vector<1x1x1xf32>
      %cst_63 = arith.constant 3.200000e+01 : f32
      %107 = arith.divf %106, %cst_63 : f32
      %108 = arith.addf %98, %107 : f32
      %c0_64 = arith.constant 0 : index
      %c0_65 = arith.constant 0 : index
      %109 = vector.load %arg8[%c0_64, %c0_65] : memref<1x32xf32, #tpu.memory_space<vmem>>, vector<1x32xf32>
      %110 = vector.shape_cast %109 : vector<1x32xf32> to vector<1x1x32xf32>
      %cst_66 = arith.constant dense<0.000000e+00> : vector<1xf32>
      %111 = vector.multi_reduction <add>, %110, %cst_66 [1, 2] : vector<1x1x32xf32> to vector<1xf32>
      %112 = vector.shape_cast %111 : vector<1xf32> to vector<1x1x1xf32>
      %113 = vector.extract %112[0, 0, 0] : f32 from vector<1x1x1xf32>
      %cst_67 = arith.constant 2.560000e+02 : f32
      %114 = arith.divf %113, %cst_67 : f32
      %115 = arith.addf %59, %83 : f32
      %cst_68 = arith.constant 3.200000e+01 : f32
      %116 = arith.divf %115, %cst_68 : f32
      %cst_69 = arith.constant 2.500000e+01 : f32
      %117 = arith.mulf %cst_69, %114 : f32
      %cst_70 = arith.constant 2.500000e+01 : f32
      %118 = arith.mulf %cst_70, %108 : f32
      %119 = arith.addf %117, %118 : f32
      %cst_71 = arith.constant 1.000000e+00 : f32
      %120 = arith.mulf %cst_71, %116 : f32
      %121 = arith.addf %119, %120 : f32
      %c0_72 = arith.constant 0 : index
      %c0_73 = arith.constant 0 : index
      %122 = memref.load %arg3[%c0_72, %c0_73] : memref<1x1xf32, #tpu.memory_space<smem>>
      memref.store %121, %arg3[%c0_72, %c0_73] : memref<1x1xf32, #tpu.memory_space<smem>>
    } else {
    }
    return
  }
  func.func @transform_0(%arg0: i32) -> (i32, i32) {
    %c0_i32 = arith.constant 0 : i32
    %c0_i32_0 = arith.constant 0 : i32
    return %arg0, %c0_i32 : i32, i32
  }
  func.func @transform_1(%arg0: i32) -> (i32, i32) {
    %c0_i32 = arith.constant 0 : i32
    %c0_i32_0 = arith.constant 0 : i32
    return %arg0, %c0_i32 : i32, i32
  }
  func.func @transform_2(%arg0: i32) -> (i32, i32) {
    %c0_i32 = arith.constant 0 : i32
    %c0_i32_0 = arith.constant 0 : i32
    %c0_i32_1 = arith.constant 0 : i32
    return %c0_i32, %c0_i32_0 : i32, i32
  }
}

</mosaic_0001>

<bundles_post_ra>
// kernel: tpu_custom_call.1
= control target key start
LH: loop header
LB: loop body
LE: loop exit
PB: predicated region body
PF: predicated region fallthrough
CT: control target
= control target key end

     0   :  { %7 = vsyncpa [#allocation8], 0  ;;  %s1208_s0 = inlined_call_operand.hbm [shape: f32[8,32], index: 0, kind: input, shape index: {}]   ;;  %s1209_s1 = inlined_call_operand.hbm [shape: f32[8,32], index: 1, kind: input, shape index: {}]   ;;  %s1210_s2 = inlined_call_operand.hbm [shape: f32[1,1], index: 2, kind: output, shape index: {}]  }
   0x1   :  { %8 = vsyncpa [#allocation11], 0 }
   0x2   :  { %9 = vsyncpa [#allocation9], 0  ;;  %s1036_s9 = smov [#allocation7]   ;;  %s1037_s11 = smov [#allocation10]  }
   0x3   :  { %s16_s10 = sshll.u32 %s1036_s9, 4  ;;  %s26_s12 = sshll.u32 %s1037_s11, 4  ;;  %s17_s10 = int_to_ptr.vmem [resolvable:$true] %s16_s10  ;;  %s27_s12 = int_to_ptr.vmem [resolvable:$true] %s26_s12 }
   0x4   :  { %s976_s15 = scalar_lea.hbm %s1208_s0, 128 }
   0x5   :  { %p977_p0 = scmp.ne.s32.totalorder %s1208_s0, %s976_s15  ;;  %p980_p1 = scmp.lt.u32.totalorder %s976_s15, %s1208_s0 }
   0x7   :  { %p982_p2 = pnand %p980_p1, %p977_p0 }
   0x9   :  { %985 = shalt.err (!%p982_p2)
}
   0xa   :  { %s986_s20 = scalar_lea.vmem %s17_s10, 128  ;;  %p991_p4 = scmp.lt.s32.totalorder %s17_s10, %s17_s10 }
   0xb   :  { %p987_p3 = scmp.ne.s32.totalorder %s17_s10, %s986_s20  ;;  %p992_p5 = scmp.lt.s32.totalorder %s986_s20, %s986_s20 }
   0xd   :  { %p993_p6 = por %p992_p5, %p991_p4 }
   0xf   :  { %p994_p7 = pnand %p993_p6, %p987_p3 }
  0x11   :  { %997 = shalt.err (!%p994_p7)
}
  0x12   :  { %19 = dma.hbm_to_vmem [thread:$0]  %s1208_s0, 128, %s17_s10, [#allocation8]  }
  0x13   :  { %s998_s25 = scalar_lea.hbm %s1209_s1, 128 }
  0x14   :  { %p999_p8 = scmp.ne.s32.totalorder %s1209_s1, %s998_s25  ;;  %p1002_p9 = scmp.lt.u32.totalorder %s998_s25, %s1209_s1 }
  0x16   :  { %p1004_p10 = pnand %p1002_p9, %p999_p8 }
  0x18   :  { %1007 = shalt.err (!%p1004_p10)
}
  0x19   :  { %s1008_s30 = scalar_lea.vmem %s27_s12, 128  ;;  %p1013_p12 = scmp.lt.s32.totalorder %s27_s12, %s27_s12 }
  0x1a   :  { %p1009_p11 = scmp.ne.s32.totalorder %s27_s12, %s1008_s30  ;;  %p1014_p13 = scmp.lt.s32.totalorder %s1008_s30, %s1008_s30 }
  0x1c   :  { %p1015_p0 = por %p1014_p13, %p1013_p12 }
  0x1e   :  { %p1016_p1 = pnand %p1015_p0, %p1009_p11 }
  0x20   :  { %1019 = shalt.err (!%p1016_p1)
}
  0x21   :  { %29 = dma.hbm_to_vmem [thread:$0]  %s1209_s1, 128, %s27_s12, [#allocation11]  }
  0x22   :  { %1030 = dma.done.wait [#allocation8], 128  }
  0x23   :  { %1031 = vsyncadd [#allocation8], 4294967168 }
  0x24   :  { %1032 = dma.done.wait [#allocation11], 128  }
  0x25   :  { %1033 = vsyncadd [#allocation11], 4294967168  ;;  %vm40_vm0 = vcmask 261120   ;;  %vm49_vm1 = vcmask 253952   ;;  %v1038_v0 = vmov 0.0   ;;  %v53_v1 = vld [vmem:[#allocation7] sm:$0xff]  ;;  %v375_v62 = vlaneseq }
  0x26   :  { %50 = vst.msk [vmem:[#allocation4] sm:$0x1] %vm49_vm1, %v1038_v0  ;;  %51 = vst.msk [vmem:[#allocation5] sm:$0x1] %vm49_vm1, %v1038_v0  ;;  %v54_v2 = vld [vmem:[#allocation10] sm:$0xff]  ;;  %59 = vxpose.xlu0.b32.start.end [1/1] (short) (narrow) %v53_v1, 32  ;;  %922 = vmatprep.subr.mxu0 %v53_v1 }
  0x27   :  { %41 = vst.msk [vmem:[#allocation2] sm:$0xff] %vm40_vm0, %v1038_v0  ;;  %42 = vst.msk [vmem:[#allocation2 + $0x8] sm:$0xff] %vm40_vm0, %v1038_v0  ;;  %v353_v3 = vsel %vm40_vm0, %v53_v1, 0.0  ;;  %v363_v4 = vsel %vm40_vm0, %v54_v2, 0.0  ;;  %v339_v5 = vsub.f32 %v53_v1, %v54_v2  ;;  %923 = vmatpush3.msra.mxu0 %v53_v1  ;;  %930 = vmatprep.subr.mxu1 %v54_v2  ;;  %vm436_vm2 = vcmask 1040384   ;;  %s1020_s26 = scalar_lea.hbm %s1210_s2, 16 }
  0x28   :  { %43 = vst.msk [vmem:[#allocation2 + $0x10] sm:$0xff] %vm40_vm0, %v1038_v0  ;;  %44 = vst.msk [vmem:[#allocation2 + $0x18] sm:$0xff] %vm40_vm0, %v1038_v0  ;;  %v354_v6 = vrot.slane %v353_v3, 4  ;;  %v364_v7 = vrot.slane %v363_v4, 4  ;;  %931 = vmatpush3.msra.mxu1 %v54_v2  ;;  %vm91_vm3 = vcmask 64512   ;;  %vm423_vm4 = vcmask 7168   ;;  %p1021_p2 = scmp.ne.s32.totalorder %s1210_s2, %s1020_s26  ;;  %p1024_p3 = scmp.lt.u32.totalorder %s1020_s26, %s1210_s2 }
  0x29   :  { %45 = vst.msk [vmem:[#allocation3] sm:$0xff] %vm40_vm0, %v1038_v0  ;;  %46 = vst.msk [vmem:[#allocation3 + $0x8] sm:$0xff] %vm40_vm0, %v1038_v0  ;;  %v341_v8 = vmul.f32 %v339_v5, %v339_v5 }
  0x2a   :  { %47 = vst.msk [vmem:[#allocation3 + $0x10] sm:$0xff] %vm40_vm0, %v1038_v0  ;;  %48 = vst.msk [vmem:[#allocation3 + $0x18] sm:$0xff] %vm40_vm0, %v1038_v0  ;;  %v355_v9 = vadd.f32 %v354_v6, %v353_v3  ;;  %v365_v10 = vadd.f32 %v364_v7, %v363_v4  ;;  %v1127_v7 = vand.u32 127, %v375_v62  ;;  %p1026_p4 = pnand %p1024_p3, %p1021_p2 }
  0x2b   :  { %52 = vst.msk [vmem:[#allocation6] sm:$0x1] %vm49_vm1, %v1038_v0  ;;  %v342_v11 = vsel %vm40_vm0, %v341_v8, 0.0 }
  0x2c   :  { %v356_v12 = vrot.slane %v355_v9, 2  ;;  %v366_v13 = vrot.slane %v365_v10, 2  ;;  %v343_v14 = vrot.slane %v342_v11, 4 }
  0x2d   :  { %v352_v21 = vld [vmem:[#allocation4] sm:$0x1]  ;;  %v362_v22 = vld [vmem:[#allocation5] sm:$0x1] }
  0x2e   :  { %v357_v15 = vadd.f32 %v356_v12, %v355_v9  ;;  %v367_v16 = vadd.f32 %v366_v13, %v365_v10  ;;  %v344_v17 = vadd.f32 %v343_v14, %v342_v11  ;;  %v56_v50 = vld [vmem:[#allocation2 + $0x8] sm:$0xff]  ;;  %v55_v51 = vld [vmem:[#allocation2] sm:$0xff] }
  0x2f   :  { %v58_v56 = vld [vmem:[#allocation2 + $0x18] sm:$0xff]  ;;  %v57_v57 = vld [vmem:[#allocation2 + $0x10] sm:$0xff] }
  0x30   :  { %v358_v18 = vrot.slane %v357_v15, 1  ;;  %v368_v19 = vrot.slane %v367_v16, 1  ;;  %v345_v20 = vrot.slane %v344_v17, 2  ;;  %v199_v63 = vld [vmem:[#allocation3 + $0x8] sm:$0xff]  ;;  %v198_v0 = vld [vmem:[#allocation3] sm:$0xff] }
  0x31   :  { %v201_v8 = vld [vmem:[#allocation3 + $0x18] sm:$0xff]  ;;  %v200_v11 = vld [vmem:[#allocation3 + $0x10] sm:$0xff] }
  0x32   :  { %v359_v23 = vadd.f32 %v358_v18, %v357_v15  ;;  %v369_v24 = vadd.f32 %v368_v19, %v367_v16  ;;  %v346_v25 = vadd.f32 %v345_v20, %v344_v17  ;;  %v340_v29 = vld [vmem:[#allocation6] sm:$0x1] }
  0x33   :  { %202 = vxpose.xlu0.b32.start.end [1/1] (short) (narrow) %v54_v2, 32  ;;  %v1120_v2 = vshrl.u32 %v375_v62, 7 }
  0x34   :  { %v360_v26 = vadd.f32 %v359_v23, %v352_v21  ;;  %v347_v27 = vrot.slane %v346_v25, 1  ;;  %v370_v28 = vadd.f32 %v369_v24, %v362_v22 }
  0x35   :  { %v1125_v6 = vadd.s32 8, %v1120_v2  ;;  %vm382_vm6 = vcmp.eq.s32.totalorder %v1120_v2, %v1127_v7  ;;  %v1138_v24 = vadd.s32 24, %v1120_v2 }
  0x36   :  { %361 = vst.msk [vmem:[#allocation4] sm:$0x1] %vm49_vm1, %v360_v26  ;;  %v348_v30 = vadd.f32 %v347_v27, %v346_v25  ;;  %371 = vst.msk [vmem:[#allocation5] sm:$0x1] %vm49_vm1, %v370_v28 }
  0x37   :  { %vm383_vm5 = vcmp.eq.s32.totalorder %v1125_v6, %v1127_v7  ;;  %vm385_vm7 = vcmp.eq.s32.totalorder %v1138_v24, %v1127_v7 }
  0x38   :  { %v349_v31 = vadd.f32 %v348_v30, %v340_v29 }
  0x3a   :  { %351 = vst.msk [vmem:[#allocation6] sm:$0x1] %vm49_vm1, %v349_v31  ;;  %v1147_v31 = vadd.s32 16, %v1120_v2 }
  0x3c   :  { %vm384_vm8 = vcmp.eq.s32.totalorder %v1147_v31, %v1127_v7 }
  0x3d   :  { %v386_v32 = vld [vmem:[#allocation4] sm:$0x1]  ;;  %v593_v33 = vld [vmem:[#allocation5] sm:$0x1] }
  0x3e   :  { %391 = vxpose.xlu1.b32.start.end [1/1] (short) (narrow) %v386_v32, 32  ;;  %938 = vmatprep.subr.msk.mxu0 %vm436_vm2, %v386_v32 }
  0x3f   :  { %946 = vmatprep.subr.msk.mxu1 %vm436_vm2, %v593_v33 }
  0x4b   :  { %598 = vxpose.xlu1.b32.start.end [1/1] (short) (narrow) %v593_v33, 32 }
  0xa6   :  { %v75_v34 = vpop.trf.xlu0 }
  0xa7   :  { %924 = vmatprep.mubr.msk.f32.mxu0 %vm91_vm3, %v75_v34 }
  0xaa   :  { %v76_v35 = vpop.trf.xlu0 }
  0xab   :  { %925 = vmatmul.mubr.msk.f32.vlgmr.msra.gmra.mrb[0].mxu0 %vm91_vm3, %v76_v35 }
  0xac   :  { %939 = vmatpush3.msk.msra.mxu0 %vm436_vm2, %v386_v32 }
  0xae   :  { %v77_v36 = vpop.trf.xlu0 }
  0xaf   :  { %927 = vmatprep.mubr.msk.f32.mxu0 %vm91_vm3, %v77_v36 }
  0xb2   :  { %v78_v37 = vpop.trf.xlu0 }
  0xb3   :  { %928 = vmatmul.mubr.msk.f32.gmra.mrb[2].mxu0 %vm91_vm3, %v78_v37 }
  0xb6   :  { %v218_v38 = vpop.trf.xlu0 }
  0xb7   :  { %932 = vmatprep.mubr.msk.f32.mxu1 %vm91_vm3, %v218_v38 }
  0xba   :  { %v219_v39 = vpop.trf.xlu0 }
  0xbb   :  { %933 = vmatmul.mubr.msk.f32.vlgmr.msra.gmra.mrb[0].mxu1 %vm91_vm3, %v219_v39 }
  0xbc   :  { %947 = vmatpush3.msk.msra.mxu1 %vm436_vm2, %v593_v33 }
  0xbe   :  { %v407_v40 = vpop.trf.xlu1  ;;  %v220_v41 = vpop.trf.xlu0 }
  0xbf   :  { %940 = vmatprep.mubr.msk.f32.mxu0 %vm423_vm4, %v407_v40  ;;  %935 = vmatprep.mubr.msk.f32.mxu1 %vm91_vm3, %v220_v41 }
  0xc2   :  { %v408_v42 = vpop.trf.xlu1  ;;  %v221_v43 = vpop.trf.xlu0 }
  0xc3   :  { %941 = vmatmul.mubr.msk.f32.vlgmr.msra.gmra.mrb[4].mxu0 %vm423_vm4, %v408_v42  ;;  %936 = vmatmul.mubr.msk.f32.gmra.mrb[2].mxu1 %vm91_vm3, %v221_v43 }
  0xc6   :  { %v409_v44 = vpop.trf.xlu1 }
  0xc7   :  { %943 = vmatprep.mubr.msk.f32.mxu0 %vm423_vm4, %v409_v44 }
  0xca   :  { %v410_v45 = vpop.trf.xlu1 }
  0xcb   :  { %944 = vmatmul.mubr.msk.f32.gmra.mrb[6].mxu0 %vm423_vm4, %v410_v45 }
  0xce   :  { %v614_v46 = vpop.trf.xlu1 }
  0xcf   :  { %948 = vmatprep.mubr.msk.f32.mxu1 %vm423_vm4, %v614_v46 }
  0xd2   :  { %v615_v47 = vpop.trf.xlu1 }
  0xd3   :  { %949 = vmatmul.mubr.msk.f32.vlgmr.msra.gmra.mrb[4].mxu1 %vm423_vm4, %v615_v47 }
  0xd6   :  { %v616_v48 = vpop.trf.xlu1 }
  0xd7   :  { %951 = vmatprep.mubr.msk.f32.mxu1 %vm423_vm4, %v616_v48 }
  0xda   :  { %v617_v49 = vpop.trf.xlu1 }
  0xdb   :  { %952 = vmatmul.mubr.msk.f32.gmra.mrb[6].mxu1 %vm423_vm4, %v617_v49 }
 0x17e   :  { %v926_v52 = vpop.f32.mrb[0].mxu0 }
 0x17f   :  { %v190_v53 = vadd.f32 %v926_v52, %v56_v50  ;;  %v170_v54 = vpop.f32.mrb[1].mxu0 }
 0x180   :  { %v189_v55 = vadd.f32 %v170_v54, %v55_v51 }
 0x181   :  { %195 = vst.msk [vmem:[#allocation2 + $0x8] sm:$0xff] %vm40_vm0, %v190_v53 }
 0x182   :  { %194 = vst.msk [vmem:[#allocation2] sm:$0xff] %vm40_vm0, %v189_v55 }
 0x186   :  { %v929_v58 = vpop.f32.mrb[2].mxu0 }
 0x187   :  { %v192_v59 = vadd.f32 %v929_v58, %v58_v56  ;;  %v180_v60 = vpop.f32.mrb[3].mxu0 }
 0x188   :  { %v191_v61 = vadd.f32 %v180_v60, %v57_v57  ;;  %v388_v9 = vld [vmem:[#allocation2 + $0x8] sm:$0xff] }
 0x189   :  { %197 = vst.msk [vmem:[#allocation2 + $0x18] sm:$0xff] %vm40_vm0, %v192_v59  ;;  %v387_v13 = vld [vmem:[#allocation2] sm:$0xff] }
 0x18a   :  { %196 = vst.msk [vmem:[#allocation2 + $0x10] sm:$0xff] %vm40_vm0, %v191_v61 }
 0x18e   :  { %v934_v1 = vpop.f32.mrb[0].mxu1 }
 0x18f   :  { %v332_v3 = vadd.f32 %v934_v1, %v199_v63  ;;  %v312_v4 = vpop.f32.mrb[1].mxu1 }
 0x190   :  { %v331_v5 = vadd.f32 %v312_v4, %v198_v0  ;;  %v390_v34 = vld [vmem:[#allocation2 + $0x18] sm:$0xff] }
 0x191   :  { %336 = vst.msk [vmem:[#allocation3 + $0x8] sm:$0xff] %vm40_vm0, %v332_v3  ;;  %v389_v39 = vld [vmem:[#allocation2 + $0x10] sm:$0xff] }
 0x192   :  { %335 = vst.msk [vmem:[#allocation3] sm:$0xff] %vm40_vm0, %v331_v5 }
 0x196   :  { %v942_v10 = vpop.f32.mrb[4].mxu0  ;;  %v937_v15 = vpop.f32.mrb[2].mxu1 }
 0x197   :  { %v526_v12 = vmul.f32 0.125, %v942_v10  ;;  %v506_v14 = vpop.f32.mrb[5].mxu0  ;;  %v334_v17 = vadd.f32 %v937_v15, %v201_v8  ;;  %v322_v18 = vpop.f32.mrb[3].mxu1 }
 0x198   :  { %v525_v16 = vmul.f32 0.125, %v506_v14  ;;  %v333_v20 = vadd.f32 %v322_v18, %v200_v11  ;;  %v595_v55 = vld [vmem:[#allocation3 + $0x8] sm:$0xff] }
 0x199   :  { %v530_v19 = vsub.f32 %v388_v9, %v526_v12  ;;  %338 = vst.msk [vmem:[#allocation3 + $0x18] sm:$0xff] %vm40_vm0, %v334_v17  ;;  %v594_v60 = vld [vmem:[#allocation3] sm:$0xff] }
 0x19a   :  { %v529_v21 = vsub.f32 %v387_v13, %v525_v16  ;;  %337 = vst.msk [vmem:[#allocation3 + $0x10] sm:$0xff] %vm40_vm0, %v333_v20 }
 0x19b   :  { %v534_v22 = vsel %vm383_vm5, %v530_v19, 0.0  ;;  %v552_v23 = vmul.f32 %v530_v19, %v530_v19 }
 0x19c   :  { %v538_v25 = vsel %vm40_vm0, %v534_v22, 0.0  ;;  %v572_v26 = vmul.f32 %v534_v22, %v534_v22  ;;  %v533_v27 = vsel %vm382_vm6, %v529_v21, 0.0  ;;  %v551_v28 = vmul.f32 %v529_v21, %v529_v21 }
 0x19d   :  { %v537_v29 = vsel %vm40_vm0, %v533_v27, 0.0  ;;  %v571_v30 = vmul.f32 %v533_v27, %v533_v27  ;;  %v556_v32 = vsel %vm40_vm0, %v552_v23, 0.0 }
 0x19e   :  { %v539_v33 = vadd.f32 %v538_v25, %v537_v29  ;;  %v945_v35 = vpop.f32.mrb[6].mxu0  ;;  %v555_v36 = vsel %vm40_vm0, %v551_v28, 0.0  ;;  %v576_v37 = vsel %vm40_vm0, %v572_v26, 0.0 }
 0x19f   :  { %v528_v38 = vmul.f32 0.125, %v945_v35  ;;  %v516_v40 = vpop.f32.mrb[7].mxu0  ;;  %v557_v41 = vadd.f32 %v556_v32, %v555_v36  ;;  %v575_v42 = vsel %vm40_vm0, %v571_v30, 0.0 }
 0x1a0   :  { %v527_v43 = vmul.f32 0.125, %v516_v40  ;;  %v577_v44 = vadd.f32 %v576_v37, %v575_v42  ;;  %v597_v6 = vld [vmem:[#allocation3 + $0x18] sm:$0xff] }
 0x1a1   :  { %v532_v45 = vsub.f32 %v390_v34, %v528_v38  ;;  %v596_v29 = vld [vmem:[#allocation3 + $0x10] sm:$0xff] }
 0x1a2   :  { %v531_v46 = vsub.f32 %v389_v39, %v527_v43 }
 0x1a3   :  { %v536_v47 = vsel %vm385_vm7, %v532_v45, 0.0  ;;  %v554_v50 = vmul.f32 %v532_v45, %v532_v45 }
 0x1a4   :  { %v535_v48 = vsel %vm384_vm8, %v531_v46, 0.0  ;;  %v553_v49 = vmul.f32 %v531_v46, %v531_v46  ;;  %v574_v53 = vmul.f32 %v536_v47, %v536_v47  ;;  %v542_v58 = vsel %vm40_vm0, %v536_v47, 0.0 }
 0x1a5   :  { %v540_v51 = vsel %vm40_vm0, %v535_v48, 0.0  ;;  %v573_v52 = vmul.f32 %v535_v48, %v535_v48  ;;  %v560_v3 = vsel %vm40_vm0, %v554_v50, 0.0 }
 0x1a6   :  { %v541_v54 = vadd.f32 %v540_v51, %v539_v33  ;;  %v950_v56 = vpop.f32.mrb[4].mxu1  ;;  %v558_v57 = vsel %vm40_vm0, %v553_v49, 0.0  ;;  %v580_v9 = vsel %vm40_vm0, %v574_v53, 0.0 }
 0x1a7   :  { %v731_v59 = vmul.f32 0.125, %v950_v56  ;;  %v711_v61 = vpop.f32.mrb[5].mxu1  ;;  %v559_v62 = vadd.f32 %v558_v57, %v557_v41  ;;  %v578_v63 = vsel %vm40_vm0, %v573_v52, 0.0 }
 0x1a8   :  { %v543_v0 = vadd.f32 %v542_v58, %v541_v54  ;;  %v730_v1 = vmul.f32 0.125, %v711_v61  ;;  %v579_v4 = vadd.f32 %v578_v63, %v577_v44 }
 0x1a9   :  { %v735_v5 = vsub.f32 %v595_v55, %v731_v59  ;;  %v561_v8 = vadd.f32 %v560_v3, %v559_v62 }
 0x1aa   :  { %v544_v10 = vrot.slane %v543_v0, 4  ;;  %v734_v11 = vsub.f32 %v594_v60, %v730_v1  ;;  %v581_v12 = vadd.f32 %v580_v9, %v579_v4 }
 0x1ab   :  { %v739_v13 = vsel %vm383_vm5, %v735_v5, 0.0  ;;  %v757_v14 = vmul.f32 %v735_v5, %v735_v5  ;;  %562 = vadd.xlane.f32.xlu0 %v561_v8 }
 0x1ac   :  { %v545_v15 = vadd.f32 %v544_v10, %v543_v0  ;;  %v743_v16 = vsel %vm40_vm0, %v739_v13, 0.0  ;;  %v777_v17 = vmul.f32 %v739_v13, %v739_v13  ;;  %v738_v18 = vsel %vm382_vm6, %v734_v11, 0.0  ;;  %v845_v13 = vld [vmem:[#allocation6] sm:$0x1] }
 0x1ad   :  { %v742_v19 = vsel %vm40_vm0, %v738_v18, 0.0  ;;  %v756_v20 = vmul.f32 %v734_v11, %v734_v11  ;;  %v776_v21 = vmul.f32 %v738_v18, %v738_v18  ;;  %v761_v22 = vsel %vm40_vm0, %v757_v14, 0.0 }
 0x1ae   :  { %v546_v23 = vrot.slane %v545_v15, 2  ;;  %v744_v25 = vadd.f32 %v743_v16, %v742_v19  ;;  %v953_v26 = vpop.f32.mrb[6].mxu1  ;;  %v781_v27 = vsel %vm40_vm0, %v777_v17, 0.0 }
 0x1af   :  { %v733_v28 = vmul.f32 0.125, %v953_v26  ;;  %v721_v30 = vpop.f32.mrb[7].mxu1  ;;  %v760_v32 = vsel %vm40_vm0, %v756_v20, 0.0  ;;  %v780_v2 = vsel %vm40_vm0, %v776_v21, 0.0 }
 0x1b0   :  { %v547_v33 = vadd.f32 %v546_v23, %v545_v15  ;;  %v732_v34 = vmul.f32 0.125, %v721_v30  ;;  %v762_v35 = vadd.f32 %v761_v22, %v760_v32  ;;  %v782_v36 = vadd.f32 %v781_v27, %v780_v2 }
 0x1b1   :  { %v737_v37 = vsub.f32 %v597_v6, %v733_v28 }
 0x1b2   :  { %v548_v38 = vrot.slane %v547_v33, 1  ;;  %v736_v39 = vsub.f32 %v596_v29, %v732_v34 }
 0x1b3   :  { %v741_v40 = vsel %vm385_vm7, %v737_v37, 0.0  ;;  %v759_v44 = vmul.f32 %v737_v37, %v737_v37 }
 0x1b4   :  { %v549_v41 = vadd.f32 %v548_v38, %v547_v33  ;;  %v740_v42 = vsel %vm384_vm8, %v736_v39, 0.0  ;;  %v758_v43 = vmul.f32 %v736_v39, %v736_v39  ;;  %v779_v47 = vmul.f32 %v741_v40, %v741_v40 }
 0x1b5   :  { %v745_v45 = vsel %vm40_vm0, %v740_v42, 0.0  ;;  %v778_v46 = vmul.f32 %v740_v42, %v740_v42  ;;  %v747_v51 = vsel %vm40_vm0, %v741_v40, 0.0  ;;  %v765_v7 = vsel %vm40_vm0, %v759_v44, 0.0 }
 0x1b6   :  { %v550_v48 = vmul.f32 0.14285715, %v549_v41  ;;  %v746_v49 = vadd.f32 %v745_v45, %v744_v25  ;;  %v763_v50 = vsel %vm40_vm0, %v758_v43, 0.0  ;;  %v785_v56 = vsel %vm40_vm0, %v779_v47, 0.0 }
 0x1b7   :  { %v764_v52 = vadd.f32 %v763_v50, %v762_v35  ;;  %v783_v24 = vsel %vm40_vm0, %v778_v46, 0.0 }
 0x1b8   :  { %v798_v53 = vadd.f32 0.0001, %v550_v48  ;;  %v748_v54 = vadd.f32 %v747_v51, %v746_v49  ;;  %v784_v31 = vadd.f32 %v783_v24, %v782_v36 }
 0x1b9   :  { %v766_v55 = vadd.f32 %v765_v7, %v764_v52 }
 0x1ba   :  { %v749_v57 = vrot.slane %v748_v54, 4  ;;  %v786_v58 = vadd.f32 %v785_v56, %v784_v31  ;;  %972 = vrsqrt.f32 %v798_v53  ;;  %vm801_vm9 = vcmp.eq.f32.partialorder %v798_v53, inf }
 0x1bb   :  { %767 = vadd.xlane.f32.xlu1 %v766_v55  ;;  %v804_v4 = vand.u32 2147483648, %v798_v53  ;;  %vm803_vm10 = vcmp.eq.f32.partialorder %v798_v53, 0.0 }
 0x1bc   :  { %v750_v59 = vadd.f32 %v749_v57, %v748_v54 }
 0x1be   :  { %v751_v60 = vrot.slane %v750_v59, 2 }
 0x1bf   :  { %582 = vadd.xlane.f32.xlu1 %v581_v12  ;;  %v846_v12 = vsel %vm49_vm1, %v845_v13, 0.0 }
 0x1c0   :  { %v752_v61 = vadd.f32 %v751_v60, %v750_v59 }
 0x1c2   :  { %v753_v62 = vrot.slane %v752_v61, 1 }
 0x1c3   :  { %787 = vadd.xlane.f32.xlu1 %v786_v58 }
 0x1c4   :  { %v973_v63 = vpop.eup %972  ;;  %v754_v0 = vadd.f32 %v753_v62, %v752_v61 }
 0x1c5   :  { %v800_v1 = vmul.f32 %v973_v63, %v798_v53 }
 0x1c6   :  { %v755_v3 = vmul.f32 0.14285715, %v754_v0 }
 0x1c7   :  { %v802_v5 = vsel %vm801_vm9, %v798_v53, %v800_v1 }
 0x1c8   :  { %v806_v8 = vadd.f32 0.0001, %v755_v3  ;;  %v805_v9 = vsel %vm803_vm10, %v804_v4, %v802_v5 }
 0x1c9   :  { %v814_v10 = vsub.f32 1.0, %v805_v9 }
 0x1ca   :  { %974 = vrsqrt.f32 %v806_v8  ;;  %vm809_vm11 = vcmp.eq.f32.partialorder %v806_v8, inf  ;;  %v812_v17 = vand.u32 2147483648, %v806_v8  ;;  %vm811_vm12 = vcmp.eq.f32.partialorder %v806_v8, 0.0 }
 0x1cb   :  { %v815_v11 = vmax.f32 %v814_v10, 0.0 }
 0x1cd   :  { %v816_v14 = vsel %vm49_vm1, %v815_v11, 0.0 }
 0x1ce   :  { %817 = vadd.xlane.f32.xlu0 %v816_v14 }
 0x1d2   :  { %847 = vadd.xlane.f32.xlu0 %v846_v12 }
 0x1d4   :  { %v975_v15 = vpop.eup %974 }
 0x1d5   :  { %v808_v16 = vmul.f32 %v975_v15, %v806_v8 }
 0x1d7   :  { %v810_v18 = vsel %vm809_vm11, %v806_v8, %v808_v16 }
 0x1d8   :  { %v813_v19 = vsel %vm811_vm12, %v812_v17, %v810_v18 }
 0x1d9   :  { %v829_v20 = vsub.f32 1.0, %v813_v19 }
 0x1db   :  { %v830_v21 = vmax.f32 %v829_v20, 0.0 }
 0x1dd   :  { %v831_v22 = vsel %vm49_vm1, %v830_v21, 0.0 }
 0x1de   :  { %832 = vadd.xlane.f32.xlu1 %v831_v22 }
 0x238   :  { %v563_v23 = vpop.xlane.xlu0 %562 }
 0x239   :  { %v564_v25 = vrot.slane %v563_v23, 4 }
 0x23b   :  { %v565_v6 = vadd.f32 %v564_v25, %v563_v23 }
 0x23d   :  { %v566_v26 = vrot.slane %v565_v6, 2 }
 0x23f   :  { %v567_v27 = vadd.f32 %v566_v26, %v565_v6 }
 0x241   :  { %v568_v28 = vrot.slane %v567_v27, 1 }
 0x243   :  { %v569_v29 = vadd.f32 %v568_v28, %v567_v27 }
 0x245   :  { %954 = vpush %v569_v29 }
 0x248   :  { %v768_v30 = vpop.xlane.xlu1 %767 }
 0x249   :  { %v769_v32 = vrot.slane %v768_v30, 4 }
 0x24b   :  { %v770_v2 = vadd.f32 %v769_v32, %v768_v30 }
 0x24c   :  { %v583_v33 = vpop.xlane.xlu1 %582 }
 0x24d   :  { %v771_v34 = vrot.slane %v770_v2, 2  ;;  %v584_v35 = vrot.slane %v583_v33, 4 }
 0x24f   :  { %v585_v36 = vadd.f32 %v584_v35, %v583_v33  ;;  %v772_v38 = vadd.f32 %v771_v34, %v770_v2 }
 0x250   :  { %v788_v37 = vpop.xlane.xlu1 %787 }
 0x251   :  { %v586_v39 = vrot.slane %v585_v36, 2  ;;  %v789_v40 = vrot.slane %v788_v37, 4  ;;  %v773_v43 = vrot.slane %v772_v38, 1 }
 0x253   :  { %v790_v41 = vadd.f32 %v789_v40, %v788_v37  ;;  %v587_v42 = vadd.f32 %v586_v39, %v585_v36  ;;  %v774_v48 = vadd.f32 %v773_v43, %v772_v38 }
 0x255   :  { %v791_v44 = vrot.slane %v790_v41, 2  ;;  %v588_v45 = vrot.slane %v587_v42, 1 }
 0x257   :  { %v589_v46 = vadd.f32 %v588_v45, %v587_v42  ;;  %v792_v47 = vadd.f32 %v791_v44, %v790_v41 }
 0x259   :  { %956 = vpush %v589_v46  ;;  %v793_v49 = vrot.slane %v792_v47, 1 }
 0x25a   :  { %958 = vpush %v774_v48 }
 0x25b   :  { %v818_v50 = vpop.xlane.xlu0 %817  ;;  %v794_v51 = vadd.f32 %v793_v49, %v792_v47 }
 0x25c   :  { %v819_v52 = vrot.slane %v818_v50, 4 }
 0x25d   :  { %960 = vpush %v794_v51 }
 0x25e   :  { %v820_v24 = vadd.f32 %v819_v52, %v818_v50 }
 0x25f   :  { %v848_v54 = vpop.xlane.xlu0 %847 }
 0x260   :  { %v821_v53 = vrot.slane %v820_v24, 2  ;;  %v849_v31 = vrot.slane %v848_v54, 4 }
 0x262   :  { %v822_v7 = vadd.f32 %v821_v53, %v820_v24  ;;  %v850_v57 = vadd.f32 %v849_v31, %v848_v54 }
 0x264   :  { %v823_v55 = vrot.slane %v822_v7, 1  ;;  %v851_v58 = vrot.slane %v850_v57, 2 }
 0x266   :  { %v824_v56 = vadd.f32 %v823_v55, %v822_v7  ;;  %v852_v62 = vadd.f32 %v851_v58, %v850_v57 }
 0x268   :  { %962 = vpush %v824_v56  ;;  %v853_v1 = vrot.slane %v852_v62, 1 }
 0x26a   :  { %v854_v5 = vadd.f32 %v853_v1, %v852_v62 }
 0x26b   :  { %v833_v59 = vpop.xlane.xlu1 %832 }
 0x26c   :  { %v834_v60 = vrot.slane %v833_v59, 4 }
 0x26e   :  { %v835_v61 = vadd.f32 %v834_v60, %v833_v59 }
 0x270   :  { %v836_v63 = vrot.slane %v835_v61, 2 }
 0x272   :  { %v837_v0 = vadd.f32 %v836_v63, %v835_v61 }
 0x274   :  { %v838_v3 = vrot.slane %v837_v0, 1 }
 0x276   :  { %v839_v4 = vadd.f32 %v838_v3, %v837_v0  ;;  %s955_s1 = spop %954 }
 0x278   :  { %964 = vpush %v839_v4 }
 0x279   :  { %966 = vpush %v854_v5 }
 0x28a   :  { %s957_s4 = spop %956 }
 0x28b   :  { %s959_s5 = spop %958  ;;  %s591_s8 = ssub.f32 %s955_s1, %s957_s4 }
 0x28d   :  { %s592_s11 = smul.f32 0.020408163, %s591_s8 }
 0x28e   :  { %s961_s6 = spop %960 }
 0x28f   :  { %s796_s7 = ssub.f32 %s959_s5, %s961_s6 }
 0x291   :  { %s797_s10 = smul.f32 0.020408163, %s796_s7 }
 0x293   :  { %s859_s16 = sadd.f32 %s797_s10, %s592_s11 }
 0x295   :  { %s862_s21 = smul.f32 0.03125, %s859_s16 }
 0x299   :  { %s963_s9 = spop %962 }
 0x29a   :  { %s828_s12 = smul.f32 0.03125, %s963_s9 }
 0x2a9   :  { %s965_s13 = spop %964 }
 0x2aa   :  { %s843_s14 = smul.f32 0.03125, %s965_s13  ;;  %s967_s15 = spop %966 }
 0x2ab   :  { %s858_s17 = smul.f32 0.00390625, %s967_s15 }
 0x2ac   :  { %s844_s18 = sadd.f32 %s843_s14, %s828_s12 }
 0x2ad   :  { %s863_s19 = smul.f32 25.0, %s858_s17 }
 0x2ae   :  { %s864_s20 = smul.f32 25.0, %s844_s18 }
 0x2b0   :  { %s865_s22 = sadd.f32 %s864_s20, %s863_s19 }
 0x2b2   :  { %s866_s23 = sadd.f32 %s865_s22, %s862_s21 }
 0x2b4   :  { %868 = sst [smem:[#allocation12]] %s866_s23 }
 0x2b5   :  { %1029 = shalt.err (!%p1026_p4)
}
 0x2b6   :  { %s1039_s0 = smov [#allocation12]  }
 0x2b7   :  { %876 = dma.smem_to_hbm %s1039_s0, 16, %s1210_s2, [#allocation9]  }
 0x2b8   :  { %1034 = dma.done.wait [#allocation9], 16  }
 0x2b9   :  { %1035 = vsyncadd [#allocation9], 4294967280 }
 0x2ba   :  { %880 = sfence }
 0x2bb   :  { %881 = vsyncpa [#allocation8], 1 }
 0x2bc   :  { %882 = vsyncpa [#allocation11], 1 }
 0x2bd   :  { %883 = vsyncpa [#allocation9], 1 }

</bundles_post_ra>
